<compile_context>
chip_gen: v5e
topology: v5e:2x2
jax: 0.10.0
libtpu: 0.0.40
codegen_flags: <defaults>
</compile_context>

<pallas_src>
import jax
import jax.numpy as jnp
from jax.experimental import pallas as pl
from jax.experimental.pallas import tpu as pltpu

_LANE_WIDTH = 1024      # last dim of the 2D view: large multiple of 128 -> unmasked vst
_TILE_ROWS = 512        # 512 x 1024 x 4B = 2 MiB per f32 buffer; 4 buffers (double-
                        # buffered in+out) = 8 MiB, fits default scoped VMEM on
                        # v5e (16 MiB), v6e (32 MiB) and v7x (32 MiB).


def _scale_shift_kernel(x_ref, o_ref):
    # Elementwise hot path: out = in * 2 + 1 (one vmul + vadd per vreg).
    o_ref[...] = x_ref[...] * 2 + 1


def pt_module_forward(x: jax.Array) -> jax.Array:
    """Pallas implementation of PtModule.forward for an NCHW tensor."""
    orig_shape = x.shape
    total = x.size

    # ---- Build a lane-dense 2D view (rows, _LANE_WIDTH), padding if needed.
    rows = pl.cdiv(total, _LANE_WIDTH)
    if rows > _TILE_ROWS:
        block_rows = _TILE_ROWS
        rows_padded = pl.cdiv(rows, block_rows) * block_rows
    else:
        # Small input: a single block covering the full array (full-extent
        # block dims are exempt from the (8, 128) divisibility rule).
        block_rows = rows
        rows_padded = rows

    padded_total = rows_padded * _LANE_WIDTH
    flat = x.reshape(-1)
    if padded_total != total:
        flat = jnp.pad(flat, (0, padded_total - total))
    x2d = flat.reshape(rows_padded, _LANE_WIDTH)

    grid = (rows_padded // block_rows,)

    out2d = pl.pallas_call(
        _scale_shift_kernel,
        out_shape=jax.ShapeDtypeStruct(x2d.shape, x2d.dtype),
        grid=grid,
        in_specs=[pl.BlockSpec((block_rows, _LANE_WIDTH), lambda i: (i, 0))],
        out_specs=pl.BlockSpec((block_rows, _LANE_WIDTH), lambda i: (i, 0)),
        compiler_params=pltpu.CompilerParams(
            dimension_semantics=("parallel",),
        ),
    )(x2d)

    # ---- Strip padding and restore the original NCHW shape.
    out = out2d.reshape(-1)
    if padded_total != total:
        out = out[:total]
    return out.reshape(orig_shape)


if __name__ == "__main__":
    key = jax.random.PRNGKey(0)
    # Small NCHW input consistent with the module's per-batch loop semantics.
    x = jax.random.normal(key, (2, 4, 16, 16), dtype=jnp.float32)

    out = pt_module_forward(x)
    out = jax.block_until_ready(out)

    # Reference check (pure JAX): x * 2 + 1
    ref = x * 2 + 1
    assert out.shape == x.shape and out.dtype == x.dtype
    assert jnp.allclose(out, ref, atol=1e-6), "mismatch vs reference"

    print("KERNEL_OK")
</pallas_src>

<mosaic_0001>
module attributes {stable_mosaic.version = 11 : i64} {
  func.func @_scale_shift_kernel(%arg0: i32, %arg1: memref<2x1024xf32, #tpu.memory_space<vmem>>, %arg2: memref<2x1024xf32, #tpu.memory_space<vmem>>) attributes {dimension_semantics = [#tpu.dimension_semantics<parallel>], iteration_bounds = array<i64: 1>, scalar_prefetch = 0 : i64, scratch_operands = 0 : i64, tpu.core_type = #tpu.core_type<tc>, window_params = [{transform_indices = @transform_0, window_bounds = array<i64: 2, 1024>}, {transform_indices = @transform_1, window_bounds = array<i64: 2, 1024>}]} {
    %c0 = arith.constant 0 : index
    %c0_0 = arith.constant 0 : index
    %0 = vector.load %arg1[%c0, %c0_0] : memref<2x1024xf32, #tpu.memory_space<vmem>>, vector<2x1024xf32>
    %cst = arith.constant 2.000000e+00 : f32
    %1 = vector.broadcast %cst : f32 to vector<2x1024xf32>
    %2 = arith.mulf %0, %1 : vector<2x1024xf32>
    %cst_1 = arith.constant 1.000000e+00 : f32
    %3 = vector.broadcast %cst_1 : f32 to vector<2x1024xf32>
    %4 = arith.addf %2, %3 : vector<2x1024xf32>
    %c0_2 = arith.constant 0 : index
    %c0_3 = arith.constant 0 : index
    %5 = vector.load %arg2[%c0_2, %c0_3] : memref<2x1024xf32, #tpu.memory_space<vmem>>, vector<2x1024xf32>
    tpu.vector_store %arg2[%c0_2, %c0_3], %4 {strides = array<i32>} : memref<2x1024xf32, #tpu.memory_space<vmem>>, vector<2x1024xf32>,
    return
  }
  func.func @transform_0(%arg0: i32) -> (i32, i32) {
    %c0_i32 = arith.constant 0 : i32
    %c0_i32_0 = arith.constant 0 : i32
    return %arg0, %c0_i32 : i32, i32
  }
  func.func @transform_1(%arg0: i32) -> (i32, i32) {
    %c0_i32 = arith.constant 0 : i32
    %c0_i32_0 = arith.constant 0 : i32
    return %arg0, %c0_i32 : i32, i32
  }
}

</mosaic_0001>

<bundles_post_ra>
// kernel: tpu_custom_call.1
= control target key start
LH: loop header
LB: loop body
LE: loop exit
PB: predicated region body
PF: predicated region fallthrough
CT: control target
= control target key end

     0   :  { %6 = vsyncpa [#allocation3], 0  ;;  %s120_s0 = inlined_call_operand.hbm [shape: f32[2,1024], index: 0, kind: input, shape index: {}]   ;;  %s121_s1 = inlined_call_operand.hbm [shape: f32[2,1024], index: 1, kind: output, shape index: {}]  }
   0x1   :  { %7 = vsyncpa [#allocation4], 0  ;;  %s13_s8 = sshll.u32 %s120_s0, 4  ;;  %s102_s9 = smov [#allocation2]   ;;  %s14_s8 = int_to_ptr.hbm [resolvable:$true] %s13_s8 }
   0x2   :  { %s15_s10 = sshll.u32 %s102_s9, 4  ;;  %s16_s10 = int_to_ptr.vmem [resolvable:$true] %s15_s10 }
   0x3   :  { %18 = dma.hbm_to_vmem [thread:$0]  %s14_s8, 256, %s16_s10, [#allocation3]  }
   0x4   :  { %98 = dma.done.wait [#allocation3], 256  }
   0x5   :  { %99 = vsyncadd [#allocation3], 4294967040  ;;  %v23_v0 = vld [vmem:[#allocation2] sm:$0xff]  ;;  %v24_v1 = vld [vmem:[#allocation2 + $0x8] sm:$0xff]  ;;  %s103_s11 = smov [#allocation5]   ;;  %s38_s15 = sshll.u32 %s121_s1, 4  ;;  %s39_s15 = int_to_ptr.hbm [resolvable:$true] %s38_s15 }
   0x6   :  { %v25_v2 = vmul.f32 2.0, %v23_v0  ;;  %v26_v3 = vmul.f32 2.0, %v24_v1  ;;  %s36_s12 = sshll.u32 %s103_s11, 4  ;;  %s37_s12 = int_to_ptr.vmem [resolvable:$true] %s36_s12 }
   0x8   :  { %v27_v4 = vadd.f32 1.0, %v25_v2  ;;  %v28_v5 = vadd.f32 1.0, %v26_v3 }
   0xa   :  { %29 = vst [vmem:[#allocation5] sm:$0xff] %v27_v4 }
   0xb   :  { %30 = vst [vmem:[#allocation5 + $0x8] sm:$0xff] %v28_v5 }
   0xc   :  { %41 = dma.vmem_to_hbm [thread:$0]  %s37_s12, 256, %s39_s15, [#allocation4]  }
   0xd   :  { %100 = dma.done.wait [#allocation4], 256  }
   0xe   :  { %101 = vsyncadd [#allocation4], 4294967040 }
   0xf   :  { %46 = vsyncpa [#allocation3], 1 }
  0x10   :  { %47 = vsyncpa [#allocation4], 1 }

</bundles_post_ra>
